<compile_context>
chip_gen: v7x
topology: tpu7x:2x2x1
jax: 0.10.0
libtpu: 0.0.40
codegen_flags: <defaults>
</compile_context>

<pallas_src>
import jax
import jax.numpy as jnp
import numpy as np
from jax.experimental import pallas as pl
from jax.experimental.pallas import tpu as pltpu

_LANE = 128      # lane width (last-dim alignment)
_SUBLANE = 8     # sublane width (second-to-last-dim alignment)


def _round_up(x, m):
    return ((x + m - 1) // m) * m


def sine_layer_kernel(x_ref, w_ref, b_ref, o_ref):
    # x_ref: (TB, Din), w_ref: (Din, TN), b_ref: (1, TN), o_ref: (TB, TN)
    y = jnp.dot(x_ref[...], w_ref[...], preferred_element_type=jnp.float32)
    y = y + b_ref[...]                      # broadcast bias over batch rows
    s = jnp.sin(y)                          # EUP slot; effectively free filler
    o_ref[...] = (s * s + y).astype(o_ref.dtype)


def _pick_tb(batch, block_b):
    """Batch tile: multiple of 8; aim for >= ~8 grid steps on large batches."""
    tb = min(block_b, _round_up(max(pl.cdiv(batch, 8), _SUBLANE), _SUBLANE))
    tb = max(_SUBLANE, tb)
    if tb >= batch:
        return batch      # single full-extent tile (full array dim is legal)
    return tb


def _pick_tn(din, dout):
    """Dout tile: full extent unless the weight slab would strain VMEM (v7x)."""
    if dout > 512 and 4 * din * dout > (8 << 20):
        return 512        # multiple of 128; ragged edge handled by Pallas
    return dout


def sine_layer(x, w, b, *, block_b=1024):
    """x: (B, Din) f32, w: (Din, Dout) f32, b: (Dout,) f32 -> (B, Dout) f32."""
    B, Din = x.shape
    Dout = w.shape[1]

    TB = _pick_tb(B, block_b)
    TN = _pick_tn(Din, Dout)
    nb = pl.cdiv(B, TB)
    nn = pl.cdiv(Dout, TN)
    resident = nn == 1            # weight/bias block index never changes

    b2 = b.reshape(1, Dout)       # metadata-only reshape, no HBM pass

    # Pinned operands: single-buffer them when their block never changes
    # (halves the resident weight VMEM; double-buffering buys nothing here).
    if resident:
        w_spec = pl.BlockSpec((Din, TN), lambda i, j: (0, j),
                              pipeline_mode=pl.Buffered(1))
        b_spec = pl.BlockSpec((1, TN), lambda i, j: (0, j),
                              pipeline_mode=pl.Buffered(1))
    else:
        w_spec = pl.BlockSpec((Din, TN), lambda i, j: (0, j))
        b_spec = pl.BlockSpec((1, TN), lambda i, j: (0, j))

    # Honest scheduler hint: bytes actually moved (no padding anywhere).
    w_reads = 1 if resident else nb
    cost = pl.CostEstimate(
        flops=2 * B * Din * Dout,
        transcendentals=B * Dout,
        bytes_accessed=4 * (B * Din * nn + Din * Dout * w_reads + Dout + B * Dout),
    )

    # VMEM budget: double-buffered x/out tiles + (single|double)-buffered w/b.
    w_bufs = 1 if resident else 2
    vmem_need = 4 * (2 * TB * Din + 2 * TB * TN + w_bufs * (Din * TN + TN))
    vmem_limit = int(min(max(vmem_need + (8 << 20), 32 << 20), 64 << 20))

    return pl.pallas_call(
        sine_layer_kernel,
        out_shape=jax.ShapeDtypeStruct((B, Dout), x.dtype),
        grid_spec=pltpu.PrefetchScalarGridSpec(
            num_scalar_prefetch=0,
            grid=(nb, nn),
            in_specs=[
                # x: one batch tile per grid step, full-extent (unpadded) Din.
                pl.BlockSpec((TB, Din), lambda i, j: (i, 0)),
                w_spec,
                b_spec,
            ],
            # output written directly at (B, Dout) — no pad + post-slice pass.
            out_specs=pl.BlockSpec((TB, TN), lambda i, j: (i, j)),
        ),
        compiler_params=pltpu.CompilerParams(
            dimension_semantics=("parallel", "parallel"),
            vmem_limit_bytes=vmem_limit,
        ),
        cost_estimate=cost,
    )(x, w, b2)


def init_sine_layer_params(key, in_features, out_features,
                           is_first=False, omega_0=30.0):
    """Deterministic SIREN-style init matching SineLayer.init_weights."""
    kw, kb = jax.random.split(key)
    if is_first:
        bound_w = 1.0 / in_features
    else:
        bound_w = np.sqrt(6.0 / in_features) / omega_0
    # weight stored as (in_features, out_features) == PyTorch weight.T
    w = jax.random.uniform(kw, (in_features, out_features), jnp.float32,
                           minval=-bound_w, maxval=bound_w)
    # bias keeps PyTorch nn.Linear default init: U(-1/sqrt(in), 1/sqrt(in))
    bound_b = 1.0 / np.sqrt(in_features)
    b = jax.random.uniform(kb, (out_features,), jnp.float32,
                           minval=-bound_b, maxval=bound_b)
    return w, b


def _reference(x, w, b):
    y = x @ w + b
    return jnp.sin(y) ** 2 + y


if __name__ == "__main__":
    key = jax.random.PRNGKey(0)
    k_x1, k_x2, k_param = jax.random.split(key, 3)

    in_features, out_features = 32, 64
    w, b = init_sine_layer_params(k_param, in_features, out_features,
                                  is_first=True, omega_0=30.0)

    # Small shape: single full-extent batch tile, resident weights.
    x_small = jax.random.normal(k_x1, (8, in_features), jnp.float32)
    out_small = jax.block_until_ready(sine_layer(x_small, w, b))
    np.testing.assert_allclose(np.asarray(out_small),
                               np.asarray(_reference(x_small, w, b)),
                               rtol=1e-5, atol=1e-5)

    # Multi-step grid with a ragged last batch tile (exercises pipelining and
    # Pallas' masked edge handling — no wrapper-side padding anywhere).
    x_med = jax.random.normal(k_x2, (200, in_features), jnp.float32)
    out_med = jax.block_until_ready(sine_layer(x_med, w, b, block_b=64))
    np.testing.assert_allclose(np.asarray(out_med),
                               np.asarray(_reference(x_med, w, b)),
                               rtol=1e-5, atol=1e-5)

    print("KERNEL_OK")
</pallas_src>

<mosaic_0001>
module attributes {stable_mosaic.version = 11 : i64} {
  func.func @sine_layer_kernel(%arg0: i32, %arg1: i32, %arg2: memref<8x32xf32, #tpu.memory_space<vmem>>, %arg3: memref<32x64xf32, #tpu.memory_space<vmem>>, %arg4: memref<1x64xf32, #tpu.memory_space<vmem>>, %arg5: memref<8x64xf32, #tpu.memory_space<vmem>>) attributes {dimension_semantics = [#tpu.dimension_semantics<parallel>, #tpu.dimension_semantics<parallel>], iteration_bounds = array<i64: 1, 1>, scalar_prefetch = 0 : i64, scratch_operands = 0 : i64, tpu.core_type = #tpu.core_type<tc>, window_params = [{transform_indices = @transform_0, window_bounds = array<i64: 8, 32>}, {pipeline_mode = #tpu.pipeline_mode<synchronous>, transform_indices = @transform_1, window_bounds = array<i64: 32, 64>}, {pipeline_mode = #tpu.pipeline_mode<synchronous>, transform_indices = @transform_2, window_bounds = array<i64: 1, 64>}, {transform_indices = @transform_3, window_bounds = array<i64: 8, 64>}]} {
    %c0 = arith.constant 0 : index
    %c0_0 = arith.constant 0 : index
    %0 = vector.load %arg2[%c0, %c0_0] : memref<8x32xf32, #tpu.memory_space<vmem>>, vector<8x32xf32>
    %c0_1 = arith.constant 0 : index
    %c0_2 = arith.constant 0 : index
    %1 = vector.load %arg3[%c0_1, %c0_2] : memref<32x64xf32, #tpu.memory_space<vmem>>, vector<32x64xf32>
    %cst = arith.constant dense<0.000000e+00> : vector<8x64xf32>
    %2 = tpu.matmul %0, %1, %cst {dimension_numbers = #tpu.dot_dimension_numbers<[1], [0], [0], [1], [0, 0, 1, 1], [], []>} : vector<8x32xf32>, vector<32x64xf32>, vector<8x64xf32> -> vector<8x64xf32>
    %c0_3 = arith.constant 0 : index
    %c0_4 = arith.constant 0 : index
    %3 = vector.load %arg4[%c0_3, %c0_4] : memref<1x64xf32, #tpu.memory_space<vmem>>, vector<1x64xf32>
    %4 = vector.broadcast %3 : vector<1x64xf32> to vector<8x64xf32>
    %5 = arith.addf %2, %4 : vector<8x64xf32>
    %6 = math.sin %5 : vector<8x64xf32>
    %7 = arith.mulf %6, %6 : vector<8x64xf32>
    %8 = arith.addf %7, %5 : vector<8x64xf32>
    %c0_5 = arith.constant 0 : index
    %c0_6 = arith.constant 0 : index
    %9 = vector.load %arg5[%c0_5, %c0_6] : memref<8x64xf32, #tpu.memory_space<vmem>>, vector<8x64xf32>
    tpu.vector_store %arg5[%c0_5, %c0_6], %8 {strides = array<i32>} : memref<8x64xf32, #tpu.memory_space<vmem>>, vector<8x64xf32>,
    return
  }
  func.func @transform_0(%arg0: i32, %arg1: i32) -> (i32, i32) {
    %c0_i32 = arith.constant 0 : i32
    %c0_i32_0 = arith.constant 0 : i32
    return %arg0, %c0_i32 : i32, i32
  }
  func.func @transform_1(%arg0: i32, %arg1: i32) -> (i32, i32) {
    %c0_i32 = arith.constant 0 : i32
    %c0_i32_0 = arith.constant 0 : i32
    return %c0_i32, %arg1 : i32, i32
  }
  func.func @transform_2(%arg0: i32, %arg1: i32) -> (i32, i32) {
    %c0_i32 = arith.constant 0 : i32
    %c0_i32_0 = arith.constant 0 : i32
    return %c0_i32, %arg1 : i32, i32
  }
  func.func @transform_3(%arg0: i32, %arg1: i32) -> (i32, i32) {
    %c0_i32 = arith.constant 0 : i32
    return %arg0, %arg1 : i32, i32
  }
}

</mosaic_0001>

<bundles_post_ra>
// kernel: tpu_custom_call.1
= control target key start
LH: loop header
LB: loop body
LE: loop exit
PB: predicated region body
PF: predicated region fallthrough
CT: control target
= control target key end

     0   :  { %8 = vsyncpa [#allocation3], 0  ;;  %s475_s0 = inlined_call_operand.hbm [shape: f32[8,32], index: 0, kind: input, shape index: {}]   ;;  %s476_s1 = inlined_call_operand.hbm [shape: f32[32,64], index: 1, kind: input, shape index: {}]   ;;  %s477_s2 = inlined_call_operand.vmem [shape: f32[1,64], index: 2, kind: input, shape index: {}]   ;;  %s478_s3 = inlined_call_operand.hbm [shape: f32[8,64], index: 3, kind: output, shape index: {}]  }
   0x1   :  { %9 = vsyncpa [#allocation6], 0 }
   0x2   :  { %10 = vsyncpa [#allocation4], 0  ;;  %s373_s12 = smov [#allocation2]   ;;  %s374_s14 = smov [#allocation5]  }
   0x3   :  { %s17_s13 = sshll.u32 %s373_s12, 4  ;;  %s26_s15 = sshll.u32 %s374_s14, 4  ;;  %s18_s13 = int_to_ptr.vmem [resolvable:$true] %s17_s13  ;;  %s407_s15 = int_to_ptr.vmem [resolvable:$true] %s26_s15 }
   0x4   :  { %s301_s18 = scalar_lea.hbm %s475_s0, 128 }
   0x5   :  { %p302_p0 = scmp.ne.s32.totalorder %s475_s0, %s301_s18  ;;  %p305_p1 = scmp.lt.u32.totalorder %s301_s18, %s475_s0 }
   0x7   :  { %p307_p2 = pnand %p305_p1, %p302_p0 }
   0x9   :  { %310 = shalt.err (!%p307_p2)
}
   0xa   :  { %s311_s23 = scalar_lea.vmem %s18_s13, 128  ;;  %p316_p4 = scmp.lt.s32.totalorder %s18_s13, %s18_s13 }
   0xb   :  { %p312_p3 = scmp.ne.s32.totalorder %s18_s13, %s311_s23  ;;  %p317_p5 = scmp.lt.s32.totalorder %s311_s23, %s311_s23 }
   0xd   :  { %p318_p6 = por %p317_p5, %p316_p4 }
   0xf   :  { %p319_p7 = pnand %p318_p6, %p312_p3 }
  0x11   :  { %322 = shalt.err (!%p319_p7)
}
  0x12   :  { %20 = dma.hbm_to_vmem [thread:$0]  %s475_s0, 128, %s18_s13, [#allocation3]  }
  0x13   :  { %s323_s28 = scalar_lea.hbm %s476_s1, 512 }
  0x14   :  { %p324_p8 = scmp.ne.s32.totalorder %s476_s1, %s323_s28  ;;  %p327_p9 = scmp.lt.u32.totalorder %s323_s28, %s476_s1 }
  0x16   :  { %p329_p10 = pnand %p327_p9, %p324_p8 }
  0x18   :  { %332 = shalt.err (!%p329_p10)
}
  0x19   :  { %s333_s6 = scalar_lea.vmem %s407_s15, 512  ;;  %p338_p12 = scmp.lt.s32.totalorder %s407_s15, %s407_s15 }
  0x1a   :  { %p334_p11 = scmp.ne.s32.totalorder %s407_s15, %s333_s6  ;;  %p339_p13 = scmp.lt.s32.totalorder %s333_s6, %s333_s6 }
  0x1c   :  { %p340_p0 = por %p339_p13, %p338_p12 }
  0x1e   :  { %p341_p1 = pnand %p340_p0, %p334_p11 }
  0x20   :  { %344 = shalt.err (!%p341_p1)
}
  0x21   :  { %s375_s0 = smov 128   ;;  %s376_s7 = smov 8  }
  0x22   :  { %32 = dma.hbm_to_vmem [thread:$0]  %s476_s1, 512, %s407_s15, [#allocation6], %s375_s0, %s375_s0, %s376_s7  }
  0x23   :  { %367 = dma.done.wait [#allocation3], 128  }
  0x24   :  { %368 = vsyncadd [#allocation3], 4294967168 }
  0x25   :  { %369 = dma.done.wait [#allocation6], 512  }
  0x26   :  { %370 = vsyncadd [#allocation6], 4294966784  ;;  %v377_v0 = vmov 0.0|0.0   ;;  %vm378_vm0 = vmmov 0   ;;  %v379_v1 = vmov 0.0   ;;  %v42_v2 = vld [vmem:[#allocation5] sm:$0xff] }
  0x27   :  { %273 = vmatprep.subr.bf16.mxu0 %v377_v0  ;;  %270 = vmatprep.mubr.msk.f32.mxu0 %vm378_vm0, %v379_v1  ;;  %v43_v3 = vld [vmem:[#allocation5 + $0x8] sm:$0xff]  ;;  %v44_v4 = vld [vmem:[#allocation5 + $0x10] sm:$0xff]  ;;  %v45_v6 = vld [vmem:[#allocation5 + $0x18] sm:$0xff]  ;;  %vm53_vm1 = vcmask 261120   ;;  %v380_v23 = vmov 683565275  }
  0x28   :  { %v274_v5 = vpack.c.bf16 %v43_v3, %v42_v2  ;;  %v277_v7 = vpack.c.bf16 %v45_v6, %v44_v4  ;;  %v41_v8 = vld [vmem:[#allocation2] sm:$0xff]  ;;  %v381_v25 = vmov 2475754826   ;;  %v382_v28 = vmov 2131351028  }
  0x29   :  { %v251_v9 = vld [vmem:[%s477_s2] ss:$0 sm:$0xff]  ;;  %v383_v31 = vmov 2102212464   ;;  %v384_v34 = vmov 920167782  }
  0x2a   :  { %275 = vmatpush3.bf16.msra.mxu0 %v274_v5  ;;  %v385_v37 = vmov 1326507024   ;;  %s386_s2 = smov [#allocation7]   ;;  %vm233_vm15 = vcmask 523264  }
  0x2b   :  { %276 = vmatprep.subr.bf16.mxu0 %v377_v0  ;;  %s241_s11 = sshll.u32 %s386_s2, 4  ;;  %s242_s11 = int_to_ptr.vmem [resolvable:$true] %s241_s11 }
  0x2c   :  { %s345_s12 = scalar_lea.vmem %s242_s11, 128  ;;  %p350_p3 = scmp.lt.s32.totalorder %s242_s11, %s242_s11 }
  0x2d   :  { %p346_p2 = scmp.ne.s32.totalorder %s242_s11, %s345_s12  ;;  %p351_p4 = scmp.lt.s32.totalorder %s345_s12, %s345_s12 }
  0x2e   :  { %278 = vmatpush3.bf16.msra.mxu0 %v277_v7 }
  0x2f   :  { %p352_p5 = por %p351_p4, %p350_p3 }
  0x31   :  { %271 = vmatmul.mubr.msk.f32.vlgmr.msra.gmra.mrb[0].mxu0 %vm53_vm1, %v41_v8  ;;  %p353_p6 = pnand %p352_p5, %p346_p2 }
 0x104   :  { %v123_v10 = vpop.f32.mrb[0].mxu0 }
 0x105   :  { %v441_v11 = vadd.f32 %v251_v9, %v123_v10  ;;  %v272_v12 = vpop.f32.mrb[1].mxu0 }
 0x107   :  { %v130_v13 = vand.u32 2139095040, %v441_v11  ;;  %v127_v17 = vand.u32 2147483647, %v441_v11  ;;  %vm129_vm9 = vcmp.lt.s32.totalorder %v441_v11, 0  ;;  %vm219_vm14 = vweird.f32 %v441_v11 }
 0x109   :  { %v131_v14 = vshrl.u32 %v130_v13, 23  ;;  %v134_v20 = vand.u32 8388607, %v127_v17  ;;  %vm128_vm10 = vcmp.le.f32.partialorder %v127_v17, 0.7853982 }
 0x10b   :  { %v253_v15 = vadd.s32 4294967169, %v131_v14  ;;  %v135_v39 = vor.u32 8388608, %v134_v20 }
 0x10d   :  { %v137_v16 = vadd.s32 1, %v253_v15  ;;  %v175_v53 = vshll.u32 %v135_v39, 8 }
 0x10f   :  { %vm138_vm2 = vcmp.gt.s32.totalorder %v137_v16, 0 }
 0x110   :  { %v139_v18 = vsel %vm138_vm2, %v137_v16, 0 }
 0x111   :  { %v141_v19 = vand.u32 31, %v139_v18  ;;  %v140_v22 = vshrl.u32 %v139_v18, 5 }
 0x113   :  { %v142_v21 = vsub.s32 32, %v141_v19  ;;  %v144_v24 = vshll.u32 %v380_v23, %v141_v19  ;;  %v147_v26 = vshll.u32 %v381_v25, %v141_v19  ;;  %v150_v30 = vshll.u32 %v382_v28, %v141_v19 }
 0x114   :  { %v153_v33 = vshll.u32 %v383_v31, %v141_v19  ;;  %v156_v36 = vshll.u32 %v384_v34, %v141_v19  ;;  %vm159_vm3 = vcmp.lt.s32.totalorder %v140_v22, 1  ;;  %vm162_vm4 = vcmp.lt.s32.totalorder %v140_v22, 4 }
 0x115   :  { %v145_v27 = vshrl.u32 %v381_v25, %v142_v21  ;;  %v148_v29 = vshrl.u32 %v382_v28, %v142_v21  ;;  %v151_v32 = vshrl.u32 %v383_v31, %v142_v21  ;;  %v154_v35 = vshrl.u32 %v384_v34, %v142_v21 }
 0x116   :  { %v157_v38 = vshrl.u32 %v385_v37, %v142_v21  ;;  %v143_v48 = vshrl.u32 %v380_v23, %v142_v21  ;;  %vm161_vm5 = vcmp.lt.s32.totalorder %v140_v22, 3  ;;  %vm160_vm6 = vcmp.lt.s32.totalorder %v140_v22, 2 }
 0x117   :  { %v146_v40 = vor.u32 %v145_v27, %v144_v24  ;;  %v149_v41 = vor.u32 %v148_v29, %v147_v26  ;;  %v152_v42 = vor.u32 %v151_v32, %v150_v30  ;;  %v155_v43 = vor.u32 %v154_v35, %v153_v33 }
 0x118   :  { %v158_v44 = vor.u32 %v157_v38, %v156_v36 }
 0x119   :  { %v164_v45 = vsel %vm162_vm4, %v152_v42, 2102212464  ;;  %v167_v46 = vsel %vm159_vm3, %v146_v40, %v149_v41  ;;  %v171_v47 = vsel %vm159_vm3, %v149_v41, %v152_v42  ;;  %v168_v49 = vsel %vm162_vm4, %v155_v43, 920167782 }
 0x11a   :  { %v172_v50 = vsel %vm162_vm4, %v158_v44, 1326507024  ;;  %v169_v51 = vsel %vm161_vm5, %v152_v42, %v168_v49  ;;  %v163_v54 = vsel %vm159_vm3, %v143_v48, %v146_v40  ;;  %v165_v55 = vsel %vm161_vm5, %v149_v41, %v164_v45 }
 0x11b   :  { %v173_v52 = vsel %vm161_vm5, %v155_v43, %v172_v50  ;;  %v170_v56 = vsel %vm160_vm6, %v167_v46, %v169_v51  ;;  %v166_v62 = vsel %vm160_vm6, %v163_v54, %v165_v55 }
 0x11c   :  { %v174_v57 = vsel %vm160_vm6, %v171_v47, %v173_v52  ;;  %v450_v60 = vmul.u32.u64.low %v175_v53, %v170_v56  ;;  %v451_v61 = vmul.u32.u64.high %v175_v53, %v170_v56, %v450_v60  ;;  %v182_v0 = vmul.u32 %v175_v53, %v166_v62 }
 0x11d   :  { %v447_v58 = vmul.u32.u64.low %v175_v53, %v174_v57  ;;  %v448_v59 = vmul.u32.u64.high %v175_v53, %v174_v57, %v447_v58 }
 0x11e   :  { %v185_v63 = vadd.s32 1, %v451_v61 }
 0x11f   :  { %vm184_vm7 = vc.u32 %v448_v59, %v450_v60  ;;  %v183_v13 = vadd.s32 %v450_v60, %v448_v59 }
 0x120   :  { %v186_v1 = vsel %vm184_vm7, %v185_v63, %v451_v61 }
 0x121   :  { %v187_v2 = vadd.s32 %v186_v1, %v182_v0 }
 0x123   :  { %v188_v3 = vadd.s32 536870912, %v187_v2 }
 0x125   :  { %v189_v4 = vshrl.u32 %v188_v3, 30 }
 0x127   :  { %v190_v5 = vshll.u32 %v189_v4, 30  ;;  %v213_v26 = vsub.s32 4, %v189_v4 }
 0x129   :  { %v191_v6 = vsub.s32 %v187_v2, %v190_v5  ;;  %v214_v29 = vsel %vm129_vm9, %v213_v26, %v189_v4 }
 0x12a   :  { %v216_v31 = vsel %vm128_vm10, 0, %v214_v29 }
 0x12b   :  { %v193_v7 = vsub.s32 0, %v191_v6  ;;  %v220_v32 = vadd.s32 3, %v216_v31 }
 0x12d   :  { %v254_v8 = vmin.u32 %v193_v7, %v191_v6  ;;  %v221_v33 = vand.u32 3, %v220_v32 }
 0x12f   :  { %v195_v9 = vclz %v254_v8  ;;  %vm226_vm11 = vcmp.eq.s32.totalorder %v221_v33, 2  ;;  %vm223_vm12 = vcmp.eq.s32.totalorder %v221_v33, 0  ;;  %vm222_vm13 = vcmp.lt.s32.totalorder %v221_v33, 2 }
 0x131   :  { %v255_v10 = vadd.s32 4294967294, %v195_v9 }
 0x133   :  { %vm256_vm8 = vcmp.lt.s32.totalorder %v255_v10, 0 }
 0x134   :  { %v198_v12 = vsel %vm256_vm8, 0, %v255_v10 }
 0x135   :  { %v199_v14 = vsub.s32 32, %v198_v12  ;;  %v203_v15 = vsub.s32 4294967266, %v198_v12  ;;  %v200_v16 = vshll.u32 %v191_v6, %v198_v12 }
 0x137   :  { %v201_v18 = vshrl.u32 %v183_v13, %v199_v14  ;;  %v204_v19 = vadd.s32 127, %v203_v15 }
 0x139   :  { %v202_v20 = vor.u32 %v201_v18, %v200_v16  ;;  %v205_v21 = vshll.u32 %v204_v19, 23 }
 0x13b   :  { %v206_v22 = vor.u32 4788187, %v205_v21  ;;  %v209_v24 = vcvt.s32.f32 %v202_v20 }
 0x13d   :  { %v207_v23 = vand.u32 2147483647, %v206_v22 }
 0x13f   :  { %v210_v25 = vmul.f32 %v209_v24, %v207_v23 }
 0x141   :  { %v211_v27 = vxor.u32 2147483648, %v210_v25 }
 0x143   :  { %v212_v28 = vsel %vm129_vm9, %v211_v27, %v210_v25 }
 0x144   :  { %v215_v30 = vsel %vm128_vm10, %v441_v11, %v212_v28 }
 0x145   :  { %297 = vcosq.f32 %v215_v30 }
 0x146   :  { %299 = vsinq.f32 %v215_v30 }
 0x14f   :  { %v298_v34 = vpop.eup %297 }
 0x150   :  { %v300_v35 = vpop.eup %299  ;;  %v227_v36 = vxor.u32 2147483648, %v298_v34 }
 0x151   :  { %v224_v37 = vxor.u32 2147483648, %v300_v35 }
 0x152   :  { %v228_v38 = vsel %vm226_vm11, %v227_v36, %v300_v35 }
 0x153   :  { %v225_v39 = vsel %vm223_vm12, %v298_v34, %v224_v37 }
 0x154   :  { %v229_v17 = vsel %vm222_vm13, %v225_v39, %v228_v38 }
 0x155   :  { %v230_v40 = vsel %vm219_vm14, nan, %v229_v17 }
 0x156   :  { %v231_v41 = vmul.f32 %v230_v40, %v230_v40 }
 0x158   :  { %v232_v42 = vadd.f32 %v231_v41, %v441_v11 }
 0x15a   :  { %234 = vst.msk [vmem:[#allocation7] sm:$0xff] %vm233_vm15, %v232_v42 }
 0x15b   :  { %356 = shalt.err (!%p353_p6)
}
 0x15c   :  { %s357_s15 = scalar_lea.hbm %s478_s3, 128 }
 0x15d   :  { %p358_p7 = scmp.ne.s32.totalorder %s478_s3, %s357_s15  ;;  %p361_p8 = scmp.lt.u32.totalorder %s357_s15, %s478_s3 }
 0x15f   :  { %p363_p9 = pnand %p361_p8, %p358_p7 }
 0x161   :  { %366 = shalt.err (!%p363_p9)
}
 0x162   :  { %244 = dma.vmem_to_hbm [thread:$0]  %s242_s11, 128, %s478_s3, [#allocation4]  }
 0x163   :  { %371 = dma.done.wait [#allocation4], 128  }
 0x164   :  { %372 = vsyncadd [#allocation4], 4294967168 }
 0x165   :  { %248 = vsyncpa [#allocation3], 1 }
 0x166   :  { %249 = vsyncpa [#allocation6], 1 }
 0x167   :  { %250 = vsyncpa [#allocation4], 1 }

</bundles_post_ra>
